<compile_context>
chip_gen: v5e
topology: v5e:2x2
jax: 0.10.0
libtpu: 0.0.40
codegen_flags: <defaults>
</compile_context>

<pallas_src>
import functools
import math

import jax
import jax.numpy as jnp
from jax import lax
from jax.experimental import pallas as pl
from jax.experimental.pallas import tpu as pltpu

QUANT_BITS = 4
QMIN = float(-2 ** (QUANT_BITS - 1) + 1)   # -7
QMAX = float(2 ** (QUANT_BITS - 1) - 1)    # +7
RANK = 4
ALPHA = 1.0
SCALING = ALPHA / RANK


# ---------------------------------------------------------------------------
# Weight preprocessing (hoisted out of the hot kernel; weight-only, no x dep)
# ---------------------------------------------------------------------------
def fake_quant_dequant(t):
    """Matches QLoRALayer.update_quantization_params + quantize + dequantize."""
    t_min = jnp.min(t)
    t_max = jnp.max(t)
    scale = (t_max - t_min) / (QMAX - QMIN)
    zp = QMIN - t_min / (scale + 1e-8)
    q = jnp.clip(jnp.round(t / (scale + 1e-8) + zp), QMIN, QMAX)
    return (q - zp) * scale


def prep_lora(lora_a, lora_b):
    """Pre-dequantize, pre-transpose, pre-fold the LoRA scaling.

    lora_a: (rank, in)  -> returns a_t: (in, rank)  bf16
    lora_b: (out, rank) -> returns b_t: (rank, out) f32, already * scaling
    """
    deq_a = fake_quant_dequant(lora_a)
    deq_b = fake_quant_dequant(lora_b)
    a_t = deq_a.T.astype(jnp.bfloat16)
    b_t = (deq_b.T * SCALING).astype(jnp.float32)
    return a_t, b_t


# ---------------------------------------------------------------------------
# Pallas kernels
# ---------------------------------------------------------------------------
def qlora_linear_kernel(x_ref, w_ref, b_ref, a_ref, bs_ref, out_ref,
                        acc_ref, xa_ref, *, relu):
    """K-tiled: base matmul + LoRA xA accumulation; epilogue only at last K."""
    k = pl.program_id(2)

    @pl.when(k == 0)
    def _init():
        acc_ref[...] = jnp.zeros_like(acc_ref)
        xa_ref[...] = jnp.zeros_like(xa_ref)

    x = x_ref[...]                                     # (tm, tk) bf16
    acc_ref[...] += jnp.dot(x, w_ref[...],             # (tk, tn) bf16
                            preferred_element_type=jnp.float32)
    xa_ref[...] += jnp.dot(x, a_ref[...],              # (tk, rank) bf16
                           preferred_element_type=jnp.float32)

    @pl.when(k == pl.num_programs(2) - 1)
    def _finalize():
        lora = jnp.dot(xa_ref[...], bs_ref[...],       # (rank, tn) f32 (pre-scaled)
                       preferred_element_type=jnp.float32)
        y = acc_ref[...] + b_ref[...] + lora           # bias broadcast (1, tn)
        if relu:
            y = jnp.maximum(y, 0.0)
        out_ref[...] = y


def similarity_kernel(v_ref, t_ref, temp_ref, out_ref):
    """L2-normalize both feature sets; cosine-sim matrix * exp(temperature)."""
    v = v_ref[...]
    t = t_ref[...]
    v_norm = jnp.maximum(jnp.sqrt(jnp.sum(v * v, axis=-1, keepdims=True)), 1e-12)
    t_norm = jnp.maximum(jnp.sqrt(jnp.sum(t * t, axis=-1, keepdims=True)), 1e-12)
    vn = v / v_norm
    tn = t / t_norm
    # contract on dim 1 of both operands: no (D, B) transpose materialized.
    logits = lax.dot_general(vn, tn,
                             dimension_numbers=(((1,), (1,)), ((), ())),
                             preferred_element_type=jnp.float32)
    out_ref[...] = logits * jnp.exp(temp_ref[0, 0])    # scalar read from SMEM


# ---------------------------------------------------------------------------
# Wrappers around pallas_call
# ---------------------------------------------------------------------------
def _pick_tile(dim, cap, align):
    """Largest tile <= cap that divides dim and keeps alignment; else full dim."""
    if dim <= cap:
        return dim
    t = math.gcd(dim, cap)
    return t if (t % align == 0) else dim


def qlora_linear(x, w_t, bias, a_t, b_t, *, relu=False):
    """x: (Bp, in) f32/bf16; w_t: (in, out) bf16; bias: (out,) f32;
    a_t: (in, rank) bf16 (dequantized A^T); b_t: (rank, out) f32 (scaling*deq_B^T)."""
    Bp, fin = x.shape
    fout = w_t.shape[1]
    rank = a_t.shape[1]

    tm = _pick_tile(Bp, 128, 8)
    tn = _pick_tile(fout, 256, 128)
    tk = _pick_tile(fin, 512, 128)
    grid = (Bp // tm, fout // tn, fin // tk)

    kernel = functools.partial(qlora_linear_kernel, relu=relu)
    return pl.pallas_call(
        kernel,
        out_shape=jax.ShapeDtypeStruct((Bp, fout), jnp.float32),
        grid_spec=pltpu.PrefetchScalarGridSpec(
            num_scalar_prefetch=0,
            grid=grid,
            in_specs=[
                pl.BlockSpec((tm, tk), lambda i, j, k: (i, k)),      # x
                pl.BlockSpec((tk, tn), lambda i, j, k: (k, j)),      # W^T
                pl.BlockSpec((1, tn), lambda i, j, k: (0, j)),       # bias
                pl.BlockSpec((tk, rank), lambda i, j, k: (k, 0)),    # deq A^T
                pl.BlockSpec((rank, tn), lambda i, j, k: (0, j)),    # scaling*deq B^T
            ],
            out_specs=pl.BlockSpec((tm, tn), lambda i, j, k: (i, j)),
            scratch_shapes=[
                pltpu.VMEM((tm, tn), jnp.float32),    # base-matmul accumulator
                pltpu.VMEM((tm, rank), jnp.float32),  # x @ A^T accumulator
            ],
        ),
        compiler_params=pltpu.CompilerParams(
            dimension_semantics=("parallel", "parallel", "arbitrary"),
        ),
    )(x.astype(jnp.bfloat16), w_t, bias.reshape(1, fout).astype(jnp.float32),
      a_t, b_t)


def similarity(vision_x, text_x, temperature):
    Bp, D = vision_x.shape
    return pl.pallas_call(
        similarity_kernel,
        out_shape=jax.ShapeDtypeStruct((Bp, Bp), jnp.float32),
        grid=(1,),
        in_specs=[
            pl.BlockSpec((Bp, D), lambda i: (0, 0)),
            pl.BlockSpec((Bp, D), lambda i: (0, 0)),
            pl.BlockSpec(memory_space=pltpu.MemorySpace.SMEM),   # scalar temperature
        ],
        out_specs=pl.BlockSpec((Bp, Bp), lambda i: (0, 0)),
    )(vision_x, text_x, temperature.reshape(1, 1).astype(jnp.float32))


# ---------------------------------------------------------------------------
# Model (deterministic synthetic parameters)
# ---------------------------------------------------------------------------
def init_params(key, *, in_dim, hidden, embed_dim, vocab):
    ks = jax.random.split(key, 8)

    def lin(k, fin, fout):
        kw, kb = jax.random.split(k)
        w = jax.random.normal(kw, (fout, fin), jnp.float32) * (1.0 / math.sqrt(fin))
        b = jax.random.normal(kb, (fout,), jnp.float32) * 0.01
        return w, b

    def qlora(k, fin, fout):
        # matches QLoRALayer.__init__: A = randn(rank, in)*0.1, B = zeros(out, rank)
        a = jax.random.normal(k, (RANK, fin), jnp.float32) * 0.1
        b = jnp.zeros((fout, RANK), jnp.float32)
        return a, b

    return {
        # vision tower: Linear(in_dim, hidden) -> ReLU -> Linear(hidden, embed_dim)
        "v_lin1": lin(ks[0], in_dim, hidden),
        "v_lin2": lin(ks[1], hidden, embed_dim),
        "v_qlora1": qlora(ks[2], in_dim, hidden),
        "v_qlora2": qlora(ks[3], hidden, embed_dim),
        # text tower: Embedding(vocab, hidden); Linear(hidden, hidden) -> ReLU -> Linear(hidden, embed_dim)
        "embedding": jax.random.normal(ks[4], (vocab, hidden), jnp.float32) * 0.02,
        "t_lin1": lin(ks[5], hidden, hidden),
        "t_lin2": lin(ks[6], hidden, embed_dim),
        "t_qlora1": qlora(ks[7], hidden, hidden),
        "t_qlora2": qlora(jax.random.fold_in(key, 99), hidden, embed_dim),
        "temperature": jnp.array(math.log(1.0 / 0.07), jnp.float32),
    }


def qlora_vlm_forward(params, images, texts):
    B = images.shape[0]
    Bp = ((B + 7) // 8) * 8                            # pad batch to sublane multiple

    def tower(x, lin_names, qlora_names):
        for (name_lin, name_q, relu) in zip(lin_names, qlora_names, (True, False)):
            w, b = params[name_lin]
            a_t, b_t = prep_lora(*params[name_q])      # quant/dequant hoisted here
            x = qlora_linear(x, w.T.astype(jnp.bfloat16), b, a_t, b_t, relu=relu)
        return x

    # vision branch: flatten NCHW -> (B, C*H*W), pad batch
    vx = images.reshape(B, -1)
    vx = jnp.pad(vx, ((0, Bp - B), (0, 0)))
    vx = tower(vx, ("v_lin1", "v_lin2"), ("v_qlora1", "v_qlora2"))

    # text branch: embedding lookup + mean over sequence (plain JAX glue)
    emb = jnp.take(params["embedding"], texts, axis=0)  # (B, S, hidden)
    tx = jnp.mean(emb, axis=1)                          # (B, hidden)
    tx = jnp.pad(tx, ((0, Bp - B), (0, 0)))
    tx = tower(tx, ("t_lin1", "t_lin2"), ("t_qlora1", "t_qlora2"))

    # normalize + cosine-similarity logits * exp(temperature), unpad
    logits = similarity(vx, tx, params["temperature"])
    return logits[:B, :B]


# ---------------------------------------------------------------------------
if __name__ == "__main__":
    key = jax.random.PRNGKey(0)
    # small, lane-aligned shapes consistent with the module's forward
    B, C, H, W = 2, 3, 16, 16
    SEQ, VOCAB, HIDDEN, EMBED = 8, 100, 128, 128
    IN_DIM = C * H * W  # 768 (multiple of 128)

    k_img, k_txt, k_par = jax.random.split(key, 3)
    images = jax.random.normal(k_img, (B, C, H, W), jnp.float32)
    texts = jax.random.randint(k_txt, (B, SEQ), 0, VOCAB, dtype=jnp.int32)

    params = init_params(k_par, in_dim=IN_DIM, hidden=HIDDEN,
                         embed_dim=EMBED, vocab=VOCAB)

    logits = jax.jit(qlora_vlm_forward)(params, images, texts)
    jax.block_until_ready(logits)
    assert logits.shape == (B, B) and logits.dtype == jnp.float32
    print("KERNEL_OK")
</pallas_src>

<mosaic_0001>
module attributes {stable_mosaic.version = 11 : i64} {
  func.func @qlora_linear_kernel(%arg0: i32, %arg1: i32, %arg2: i32, %arg3: memref<8x256xbf16, #tpu.memory_space<vmem>>, %arg4: memref<256x128xbf16, #tpu.memory_space<vmem>>, %arg5: memref<1x128xf32, #tpu.memory_space<vmem>>, %arg6: memref<256x4xbf16, #tpu.memory_space<vmem>>, %arg7: memref<4x128xf32, #tpu.memory_space<vmem>>, %arg8: memref<8x128xf32, #tpu.memory_space<vmem>>, %arg9: memref<8x128xf32, #tpu.memory_space<vmem>>, %arg10: memref<8x4xf32, #tpu.memory_space<vmem>>) attributes {dimension_semantics = [#tpu.dimension_semantics<parallel>, #tpu.dimension_semantics<parallel>, #tpu.dimension_semantics<arbitrary>], iteration_bounds = array<i64: 1, 1, 3>, scalar_prefetch = 0 : i64, scratch_operands = 2 : i64, tpu.core_type = #tpu.core_type<tc>, window_params = [{transform_indices = @transform_0, window_bounds = array<i64: 8, 256>}, {transform_indices = @transform_1, window_bounds = array<i64: 256, 128>}, {transform_indices = @transform_2, window_bounds = array<i64: 1, 128>}, {transform_indices = @transform_3, window_bounds = array<i64: 256, 4>}, {transform_indices = @transform_4, window_bounds = array<i64: 4, 128>}, {transform_indices = @transform_5, window_bounds = array<i64: 8, 128>}]} {
    %c0_i32 = arith.constant 0 : i32
    %0 = arith.cmpi eq, %arg2, %c0_i32 : i32
    %1 = arith.extui %0 : i1 to i32
    %c0_i32_0 = arith.constant 0 : i32
    %2 = arith.cmpi ne, %1, %c0_i32_0 : i32
    scf.if %2 {
      %cst_16 = arith.constant 0.000000e+00 : f32
      %17 = vector.broadcast %cst_16 : f32 to vector<8x128xf32>
      %c0_17 = arith.constant 0 : index
      %c0_18 = arith.constant 0 : index
      %18 = vector.load %arg9[%c0_17, %c0_18] : memref<8x128xf32, #tpu.memory_space<vmem>>, vector<8x128xf32>
      tpu.vector_store %arg9[%c0_17, %c0_18], %17 {strides = array<i32>} : memref<8x128xf32, #tpu.memory_space<vmem>>, vector<8x128xf32>,
      %cst_19 = arith.constant 0.000000e+00 : f32
      %19 = vector.broadcast %cst_19 : f32 to vector<8x4xf32>
      %c0_20 = arith.constant 0 : index
      %c0_21 = arith.constant 0 : index
      %20 = vector.load %arg10[%c0_20, %c0_21] : memref<8x4xf32, #tpu.memory_space<vmem>>, vector<8x4xf32>
      tpu.vector_store %arg10[%c0_20, %c0_21], %19 {strides = array<i32>} : memref<8x4xf32, #tpu.memory_space<vmem>>, vector<8x4xf32>,
    } else {
    }
    %c0 = arith.constant 0 : index
    %c0_1 = arith.constant 0 : index
    %3 = vector.load %arg3[%c0, %c0_1] : memref<8x256xbf16, #tpu.memory_space<vmem>>, vector<8x256xbf16>
    %c0_2 = arith.constant 0 : index
    %c0_3 = arith.constant 0 : index
    %4 = vector.load %arg9[%c0_2, %c0_3] : memref<8x128xf32, #tpu.memory_space<vmem>>, vector<8x128xf32>
    %c0_4 = arith.constant 0 : index
    %c0_5 = arith.constant 0 : index
    %5 = vector.load %arg4[%c0_4, %c0_5] : memref<256x128xbf16, #tpu.memory_space<vmem>>, vector<256x128xbf16>
    %cst = arith.constant dense<0.000000e+00> : vector<8x128xf32>
    %6 = tpu.matmul %3, %5, %cst {dimension_numbers = #tpu.dot_dimension_numbers<[1], [0], [0], [1], [0, 0, 1, 1], [], []>} : vector<8x256xbf16>, vector<256x128xbf16>, vector<8x128xf32> -> vector<8x128xf32>
    %7 = arith.addf %4, %6 : vector<8x128xf32>
    %c0_6 = arith.constant 0 : index
    %c0_7 = arith.constant 0 : index
    %8 = vector.load %arg9[%c0_6, %c0_7] : memref<8x128xf32, #tpu.memory_space<vmem>>, vector<8x128xf32>
    tpu.vector_store %arg9[%c0_6, %c0_7], %7 {strides = array<i32>} : memref<8x128xf32, #tpu.memory_space<vmem>>, vector<8x128xf32>,
    %c0_8 = arith.constant 0 : index
    %c0_9 = arith.constant 0 : index
    %9 = vector.load %arg10[%c0_8, %c0_9] : memref<8x4xf32, #tpu.memory_space<vmem>>, vector<8x4xf32>
    %c0_10 = arith.constant 0 : index
    %c0_11 = arith.constant 0 : index
    %10 = vector.load %arg6[%c0_10, %c0_11] : memref<256x4xbf16, #tpu.memory_space<vmem>>, vector<256x4xbf16>
    %cst_12 = arith.constant dense<0.000000e+00> : vector<8x4xf32>
    %11 = tpu.matmul %3, %10, %cst_12 {dimension_numbers = #tpu.dot_dimension_numbers<[1], [0], [0], [1], [0, 0, 1, 1], [], []>} : vector<8x256xbf16>, vector<256x4xbf16>, vector<8x4xf32> -> vector<8x4xf32>
    %12 = arith.addf %9, %11 : vector<8x4xf32>
    %c0_13 = arith.constant 0 : index
    %c0_14 = arith.constant 0 : index
    %13 = vector.load %arg10[%c0_13, %c0_14] : memref<8x4xf32, #tpu.memory_space<vmem>>, vector<8x4xf32>
    tpu.vector_store %arg10[%c0_13, %c0_14], %12 {strides = array<i32>} : memref<8x4xf32, #tpu.memory_space<vmem>>, vector<8x4xf32>,
    %c2_i32 = arith.constant 2 : i32
    %14 = arith.cmpi eq, %arg2, %c2_i32 : i32
    %15 = arith.extui %14 : i1 to i32
    %c0_i32_15 = arith.constant 0 : i32
    %16 = arith.cmpi ne, %15, %c0_i32_15 : i32
    scf.if %16 {
      %c0_16 = arith.constant 0 : index
      %c0_17 = arith.constant 0 : index
      %17 = vector.load %arg10[%c0_16, %c0_17] : memref<8x4xf32, #tpu.memory_space<vmem>>, vector<8x4xf32>
      %c0_18 = arith.constant 0 : index
      %c0_19 = arith.constant 0 : index
      %18 = vector.load %arg7[%c0_18, %c0_19] : memref<4x128xf32, #tpu.memory_space<vmem>>, vector<4x128xf32>
      %cst_20 = arith.constant dense<0.000000e+00> : vector<8x128xf32>
      %19 = tpu.matmul %17, %18, %cst_20 {dimension_numbers = #tpu.dot_dimension_numbers<[1], [0], [0], [1], [0, 0, 1, 1], [], []>} : vector<8x4xf32>, vector<4x128xf32>, vector<8x128xf32> -> vector<8x128xf32>
      %c0_21 = arith.constant 0 : index
      %c0_22 = arith.constant 0 : index
      %20 = vector.load %arg9[%c0_21, %c0_22] : memref<8x128xf32, #tpu.memory_space<vmem>>, vector<8x128xf32>
      %c0_23 = arith.constant 0 : index
      %c0_24 = arith.constant 0 : index
      %21 = vector.load %arg5[%c0_23, %c0_24] : memref<1x128xf32, #tpu.memory_space<vmem>>, vector<1x128xf32>
      %22 = vector.broadcast %21 : vector<1x128xf32> to vector<8x128xf32>
      %23 = arith.addf %20, %22 : vector<8x128xf32>
      %24 = arith.addf %23, %19 : vector<8x128xf32>
      %cst_25 = arith.constant 0.000000e+00 : f32
      %25 = vector.broadcast %cst_25 : f32 to vector<8x128xf32>
      %26 = arith.maximumf %24, %25 : vector<8x128xf32>
      %c0_26 = arith.constant 0 : index
      %c0_27 = arith.constant 0 : index
      %27 = vector.load %arg8[%c0_26, %c0_27] : memref<8x128xf32, #tpu.memory_space<vmem>>, vector<8x128xf32>
      tpu.vector_store %arg8[%c0_26, %c0_27], %26 {strides = array<i32>} : memref<8x128xf32, #tpu.memory_space<vmem>>, vector<8x128xf32>,
    } else {
    }
    return
  }
  func.func @transform_0(%arg0: i32, %arg1: i32, %arg2: i32) -> (i32, i32) {
    %c0_i32 = arith.constant 0 : i32
    return %arg0, %arg2 : i32, i32
  }
  func.func @transform_1(%arg0: i32, %arg1: i32, %arg2: i32) -> (i32, i32) {
    %c0_i32 = arith.constant 0 : i32
    return %arg2, %arg1 : i32, i32
  }
  func.func @transform_2(%arg0: i32, %arg1: i32, %arg2: i32) -> (i32, i32) {
    %c0_i32 = arith.constant 0 : i32
    %c0_i32_0 = arith.constant 0 : i32
    return %c0_i32, %arg1 : i32, i32
  }
  func.func @transform_3(%arg0: i32, %arg1: i32, %arg2: i32) -> (i32, i32) {
    %c0_i32 = arith.constant 0 : i32
    %c0_i32_0 = arith.constant 0 : i32
    return %arg2, %c0_i32 : i32, i32
  }
  func.func @transform_4(%arg0: i32, %arg1: i32, %arg2: i32) -> (i32, i32) {
    %c0_i32 = arith.constant 0 : i32
    %c0_i32_0 = arith.constant 0 : i32
    return %c0_i32, %arg1 : i32, i32
  }
  func.func @transform_5(%arg0: i32, %arg1: i32, %arg2: i32) -> (i32, i32) {
    %c0_i32 = arith.constant 0 : i32
    return %arg0, %arg1 : i32, i32
  }
}

module attributes {stable_mosaic.version = 11 : i64} {
  func.func @qlora_linear_kernel(%arg0: i32, %arg1: i32, %arg2: i32, %arg3: memref<8x128xbf16, #tpu.memory_space<vmem>>, %arg4: memref<128x128xbf16, #tpu.memory_space<vmem>>, %arg5: memref<1x128xf32, #tpu.memory_space<vmem>>, %arg6: memref<128x4xbf16, #tpu.memory_space<vmem>>, %arg7: memref<4x128xf32, #tpu.memory_space<vmem>>, %arg8: memref<8x128xf32, #tpu.memory_space<vmem>>, %arg9: memref<8x128xf32, #tpu.memory_space<vmem>>, %arg10: memref<8x4xf32, #tpu.memory_space<vmem>>) attributes {dimension_semantics = [#tpu.dimension_semantics<parallel>, #tpu.dimension_semantics<parallel>, #tpu.dimension_semantics<arbitrary>], iteration_bounds = array<i64: 1, 1, 1>, scalar_prefetch = 0 : i64, scratch_operands = 2 : i64, tpu.core_type = #tpu.core_type<tc>, window_params = [{transform_indices = @transform_0, window_bounds = array<i64: 8, 128>}, {transform_indices = @transform_1, window_bounds = array<i64: 128, 128>}, {transform_indices = @transform_2, window_bounds = array<i64: 1, 128>}, {transform_indices = @transform_3, window_bounds = array<i64: 128, 4>}, {transform_indices = @transform_4, window_bounds = array<i64: 4, 128>}, {transform_indices = @transform_5, window_bounds = array<i64: 8, 128>}]} {
    %c0_i32 = arith.constant 0 : i32
    %0 = arith.cmpi eq, %arg2, %c0_i32 : i32
    %1 = arith.extui %0 : i1 to i32
    %c0_i32_0 = arith.constant 0 : i32
    %2 = arith.cmpi ne, %1, %c0_i32_0 : i32
    scf.if %2 {
      %cst_17 = arith.constant 0.000000e+00 : f32
      %17 = vector.broadcast %cst_17 : f32 to vector<8x128xf32>
      %c0_18 = arith.constant 0 : index
      %c0_19 = arith.constant 0 : index
      %18 = vector.load %arg9[%c0_18, %c0_19] : memref<8x128xf32, #tpu.memory_space<vmem>>, vector<8x128xf32>
      tpu.vector_store %arg9[%c0_18, %c0_19], %17 {strides = array<i32>} : memref<8x128xf32, #tpu.memory_space<vmem>>, vector<8x128xf32>,
      %cst_20 = arith.constant 0.000000e+00 : f32
      %19 = vector.broadcast %cst_20 : f32 to vector<8x4xf32>
      %c0_21 = arith.constant 0 : index
      %c0_22 = arith.constant 0 : index
      %20 = vector.load %arg10[%c0_21, %c0_22] : memref<8x4xf32, #tpu.memory_space<vmem>>, vector<8x4xf32>
      tpu.vector_store %arg10[%c0_21, %c0_22], %19 {strides = array<i32>} : memref<8x4xf32, #tpu.memory_space<vmem>>, vector<8x4xf32>,
    } else {
    }
    %c0 = arith.constant 0 : index
    %c0_1 = arith.constant 0 : index
    %3 = vector.load %arg3[%c0, %c0_1] : memref<8x128xbf16, #tpu.memory_space<vmem>>, vector<8x128xbf16>
    %c0_2 = arith.constant 0 : index
    %c0_3 = arith.constant 0 : index
    %4 = vector.load %arg9[%c0_2, %c0_3] : memref<8x128xf32, #tpu.memory_space<vmem>>, vector<8x128xf32>
    %c0_4 = arith.constant 0 : index
    %c0_5 = arith.constant 0 : index
    %5 = vector.load %arg4[%c0_4, %c0_5] : memref<128x128xbf16, #tpu.memory_space<vmem>>, vector<128x128xbf16>
    %cst = arith.constant dense<0.000000e+00> : vector<8x128xf32>
    %6 = tpu.matmul %3, %5, %cst {dimension_numbers = #tpu.dot_dimension_numbers<[1], [0], [0], [1], [0, 0, 1, 1], [], []>} : vector<8x128xbf16>, vector<128x128xbf16>, vector<8x128xf32> -> vector<8x128xf32>
    %7 = arith.addf %4, %6 : vector<8x128xf32>
    %c0_6 = arith.constant 0 : index
    %c0_7 = arith.constant 0 : index
    %8 = vector.load %arg9[%c0_6, %c0_7] : memref<8x128xf32, #tpu.memory_space<vmem>>, vector<8x128xf32>
    tpu.vector_store %arg9[%c0_6, %c0_7], %7 {strides = array<i32>} : memref<8x128xf32, #tpu.memory_space<vmem>>, vector<8x128xf32>,
    %c0_8 = arith.constant 0 : index
    %c0_9 = arith.constant 0 : index
    %9 = vector.load %arg10[%c0_8, %c0_9] : memref<8x4xf32, #tpu.memory_space<vmem>>, vector<8x4xf32>
    %c0_10 = arith.constant 0 : index
    %c0_11 = arith.constant 0 : index
    %10 = vector.load %arg6[%c0_10, %c0_11] : memref<128x4xbf16, #tpu.memory_space<vmem>>, vector<128x4xbf16>
    %cst_12 = arith.constant dense<0.000000e+00> : vector<8x4xf32>
    %11 = tpu.matmul %3, %10, %cst_12 {dimension_numbers = #tpu.dot_dimension_numbers<[1], [0], [0], [1], [0, 0, 1, 1], [], []>} : vector<8x128xbf16>, vector<128x4xbf16>, vector<8x4xf32> -> vector<8x4xf32>
    %12 = arith.addf %9, %11 : vector<8x4xf32>
    %c0_13 = arith.constant 0 : index
    %c0_14 = arith.constant 0 : index
    %13 = vector.load %arg10[%c0_13, %c0_14] : memref<8x4xf32, #tpu.memory_space<vmem>>, vector<8x4xf32>
    tpu.vector_store %arg10[%c0_13, %c0_14], %12 {strides = array<i32>} : memref<8x4xf32, #tpu.memory_space<vmem>>, vector<8x4xf32>,
    %c0_i32_15 = arith.constant 0 : i32
    %14 = arith.cmpi eq, %arg2, %c0_i32_15 : i32
    %15 = arith.extui %14 : i1 to i32
    %c0_i32_16 = arith.constant 0 : i32
    %16 = arith.cmpi ne, %15, %c0_i32_16 : i32
    scf.if %16 {
      %c0_17 = arith.constant 0 : index
      %c0_18 = arith.constant 0 : index
      %17 = vector.load %arg10[%c0_17, %c0_18] : memref<8x4xf32, #tpu.memory_space<vmem>>, vector<8x4xf32>
      %c0_19 = arith.constant 0 : index
      %c0_20 = arith.constant 0 : index
      %18 = vector.load %arg7[%c0_19, %c0_20] : memref<4x128xf32, #tpu.memory_space<vmem>>, vector<4x128xf32>
      %cst_21 = arith.constant dense<0.000000e+00> : vector<8x128xf32>
      %19 = tpu.matmul %17, %18, %cst_21 {dimension_numbers = #tpu.dot_dimension_numbers<[1], [0], [0], [1], [0, 0, 1, 1], [], []>} : vector<8x4xf32>, vector<4x128xf32>, vector<8x128xf32> -> vector<8x128xf32>
      %c0_22 = arith.constant 0 : index
      %c0_23 = arith.constant 0 : index
      %20 = vector.load %arg9[%c0_22, %c0_23] : memref<8x128xf32, #tpu.memory_space<vmem>>, vector<8x128xf32>
      %c0_24 = arith.constant 0 : index
      %c0_25 = arith.constant 0 : index
      %21 = vector.load %arg5[%c0_24, %c0_25] : memref<1x128xf32, #tpu.memory_space<vmem>>, vector<1x128xf32>
      %22 = vector.broadcast %21 : vector<1x128xf32> to vector<8x128xf32>
      %23 = arith.addf %20, %22 : vector<8x128xf32>
      %24 = arith.addf %23, %19 : vector<8x128xf32>
      %c0_26 = arith.constant 0 : index
      %c0_27 = arith.constant 0 : index
      %25 = vector.load %arg8[%c0_26, %c0_27] : memref<8x128xf32, #tpu.memory_space<vmem>>, vector<8x128xf32>
      tpu.vector_store %arg8[%c0_26, %c0_27], %24 {strides = array<i32>} : memref<8x128xf32, #tpu.memory_space<vmem>>, vector<8x128xf32>,
    } else {
    }
    return
  }
  func.func @transform_0(%arg0: i32, %arg1: i32, %arg2: i32) -> (i32, i32) {
    %c0_i32 = arith.constant 0 : i32
    return %arg0, %arg2 : i32, i32
  }
  func.func @transform_1(%arg0: i32, %arg1: i32, %arg2: i32) -> (i32, i32) {
    %c0_i32 = arith.constant 0 : i32
    return %arg2, %arg1 : i32, i32
  }
  func.func @transform_2(%arg0: i32, %arg1: i32, %arg2: i32) -> (i32, i32) {
    %c0_i32 = arith.constant 0 : i32
    %c0_i32_0 = arith.constant 0 : i32
    return %c0_i32, %arg1 : i32, i32
  }
  func.func @transform_3(%arg0: i32, %arg1: i32, %arg2: i32) -> (i32, i32) {
    %c0_i32 = arith.constant 0 : i32
    %c0_i32_0 = arith.constant 0 : i32
    return %arg2, %c0_i32 : i32, i32
  }
  func.func @transform_4(%arg0: i32, %arg1: i32, %arg2: i32) -> (i32, i32) {
    %c0_i32 = arith.constant 0 : i32
    %c0_i32_0 = arith.constant 0 : i32
    return %c0_i32, %arg1 : i32, i32
  }
  func.func @transform_5(%arg0: i32, %arg1: i32, %arg2: i32) -> (i32, i32) {
    %c0_i32 = arith.constant 0 : i32
    return %arg0, %arg1 : i32, i32
  }
}

module attributes {stable_mosaic.version = 11 : i64} {
  func.func @qlora_linear_kernel(%arg0: i32, %arg1: i32, %arg2: i32, %arg3: memref<8x128xbf16, #tpu.memory_space<vmem>>, %arg4: memref<128x128xbf16, #tpu.memory_space<vmem>>, %arg5: memref<1x128xf32, #tpu.memory_space<vmem>>, %arg6: memref<128x4xbf16, #tpu.memory_space<vmem>>, %arg7: memref<4x128xf32, #tpu.memory_space<vmem>>, %arg8: memref<8x128xf32, #tpu.memory_space<vmem>>, %arg9: memref<8x128xf32, #tpu.memory_space<vmem>>, %arg10: memref<8x4xf32, #tpu.memory_space<vmem>>) attributes {dimension_semantics = [#tpu.dimension_semantics<parallel>, #tpu.dimension_semantics<parallel>, #tpu.dimension_semantics<arbitrary>], iteration_bounds = array<i64: 1, 1, 1>, scalar_prefetch = 0 : i64, scratch_operands = 2 : i64, tpu.core_type = #tpu.core_type<tc>, window_params = [{transform_indices = @transform_0, window_bounds = array<i64: 8, 128>}, {transform_indices = @transform_1, window_bounds = array<i64: 128, 128>}, {transform_indices = @transform_2, window_bounds = array<i64: 1, 128>}, {transform_indices = @transform_3, window_bounds = array<i64: 128, 4>}, {transform_indices = @transform_4, window_bounds = array<i64: 4, 128>}, {transform_indices = @transform_5, window_bounds = array<i64: 8, 128>}]} {
    %c0_i32 = arith.constant 0 : i32
    %0 = arith.cmpi eq, %arg2, %c0_i32 : i32
    %1 = arith.extui %0 : i1 to i32
    %c0_i32_0 = arith.constant 0 : i32
    %2 = arith.cmpi ne, %1, %c0_i32_0 : i32
    scf.if %2 {
      %cst_17 = arith.constant 0.000000e+00 : f32
      %17 = vector.broadcast %cst_17 : f32 to vector<8x128xf32>
      %c0_18 = arith.constant 0 : index
      %c0_19 = arith.constant 0 : index
      %18 = vector.load %arg9[%c0_18, %c0_19] : memref<8x128xf32, #tpu.memory_space<vmem>>, vector<8x128xf32>
      tpu.vector_store %arg9[%c0_18, %c0_19], %17 {strides = array<i32>} : memref<8x128xf32, #tpu.memory_space<vmem>>, vector<8x128xf32>,
      %cst_20 = arith.constant 0.000000e+00 : f32
      %19 = vector.broadcast %cst_20 : f32 to vector<8x4xf32>
      %c0_21 = arith.constant 0 : index
      %c0_22 = arith.constant 0 : index
      %20 = vector.load %arg10[%c0_21, %c0_22] : memref<8x4xf32, #tpu.memory_space<vmem>>, vector<8x4xf32>
      tpu.vector_store %arg10[%c0_21, %c0_22], %19 {strides = array<i32>} : memref<8x4xf32, #tpu.memory_space<vmem>>, vector<8x4xf32>,
    } else {
    }
    %c0 = arith.constant 0 : index
    %c0_1 = arith.constant 0 : index
    %3 = vector.load %arg3[%c0, %c0_1] : memref<8x128xbf16, #tpu.memory_space<vmem>>, vector<8x128xbf16>
    %c0_2 = arith.constant 0 : index
    %c0_3 = arith.constant 0 : index
    %4 = vector.load %arg9[%c0_2, %c0_3] : memref<8x128xf32, #tpu.memory_space<vmem>>, vector<8x128xf32>
    %c0_4 = arith.constant 0 : index
    %c0_5 = arith.constant 0 : index
    %5 = vector.load %arg4[%c0_4, %c0_5] : memref<128x128xbf16, #tpu.memory_space<vmem>>, vector<128x128xbf16>
    %cst = arith.constant dense<0.000000e+00> : vector<8x128xf32>
    %6 = tpu.matmul %3, %5, %cst {dimension_numbers = #tpu.dot_dimension_numbers<[1], [0], [0], [1], [0, 0, 1, 1], [], []>} : vector<8x128xbf16>, vector<128x128xbf16>, vector<8x128xf32> -> vector<8x128xf32>
    %7 = arith.addf %4, %6 : vector<8x128xf32>
    %c0_6 = arith.constant 0 : index
    %c0_7 = arith.constant 0 : index
    %8 = vector.load %arg9[%c0_6, %c0_7] : memref<8x128xf32, #tpu.memory_space<vmem>>, vector<8x128xf32>
    tpu.vector_store %arg9[%c0_6, %c0_7], %7 {strides = array<i32>} : memref<8x128xf32, #tpu.memory_space<vmem>>, vector<8x128xf32>,
    %c0_8 = arith.constant 0 : index
    %c0_9 = arith.constant 0 : index
    %9 = vector.load %arg10[%c0_8, %c0_9] : memref<8x4xf32, #tpu.memory_space<vmem>>, vector<8x4xf32>
    %c0_10 = arith.constant 0 : index
    %c0_11 = arith.constant 0 : index
    %10 = vector.load %arg6[%c0_10, %c0_11] : memref<128x4xbf16, #tpu.memory_space<vmem>>, vector<128x4xbf16>
    %cst_12 = arith.constant dense<0.000000e+00> : vector<8x4xf32>
    %11 = tpu.matmul %3, %10, %cst_12 {dimension_numbers = #tpu.dot_dimension_numbers<[1], [0], [0], [1], [0, 0, 1, 1], [], []>} : vector<8x128xbf16>, vector<128x4xbf16>, vector<8x4xf32> -> vector<8x4xf32>
    %12 = arith.addf %9, %11 : vector<8x4xf32>
    %c0_13 = arith.constant 0 : index
    %c0_14 = arith.constant 0 : index
    %13 = vector.load %arg10[%c0_13, %c0_14] : memref<8x4xf32, #tpu.memory_space<vmem>>, vector<8x4xf32>
    tpu.vector_store %arg10[%c0_13, %c0_14], %12 {strides = array<i32>} : memref<8x4xf32, #tpu.memory_space<vmem>>, vector<8x4xf32>,
    %c0_i32_15 = arith.constant 0 : i32
    %14 = arith.cmpi eq, %arg2, %c0_i32_15 : i32
    %15 = arith.extui %14 : i1 to i32
    %c0_i32_16 = arith.constant 0 : i32
    %16 = arith.cmpi ne, %15, %c0_i32_16 : i32
    scf.if %16 {
      %c0_17 = arith.constant 0 : index
      %c0_18 = arith.constant 0 : index
      %17 = vector.load %arg10[%c0_17, %c0_18] : memref<8x4xf32, #tpu.memory_space<vmem>>, vector<8x4xf32>
      %c0_19 = arith.constant 0 : index
      %c0_20 = arith.constant 0 : index
      %18 = vector.load %arg7[%c0_19, %c0_20] : memref<4x128xf32, #tpu.memory_space<vmem>>, vector<4x128xf32>
      %cst_21 = arith.constant dense<0.000000e+00> : vector<8x128xf32>
      %19 = tpu.matmul %17, %18, %cst_21 {dimension_numbers = #tpu.dot_dimension_numbers<[1], [0], [0], [1], [0, 0, 1, 1], [], []>} : vector<8x4xf32>, vector<4x128xf32>, vector<8x128xf32> -> vector<8x128xf32>
      %c0_22 = arith.constant 0 : index
      %c0_23 = arith.constant 0 : index
      %20 = vector.load %arg9[%c0_22, %c0_23] : memref<8x128xf32, #tpu.memory_space<vmem>>, vector<8x128xf32>
      %c0_24 = arith.constant 0 : index
      %c0_25 = arith.constant 0 : index
      %21 = vector.load %arg5[%c0_24, %c0_25] : memref<1x128xf32, #tpu.memory_space<vmem>>, vector<1x128xf32>
      %22 = vector.broadcast %21 : vector<1x128xf32> to vector<8x128xf32>
      %23 = arith.addf %20, %22 : vector<8x128xf32>
      %24 = arith.addf %23, %19 : vector<8x128xf32>
      %cst_26 = arith.constant 0.000000e+00 : f32
      %25 = vector.broadcast %cst_26 : f32 to vector<8x128xf32>
      %26 = arith.maximumf %24, %25 : vector<8x128xf32>
      %c0_27 = arith.constant 0 : index
      %c0_28 = arith.constant 0 : index
      %27 = vector.load %arg8[%c0_27, %c0_28] : memref<8x128xf32, #tpu.memory_space<vmem>>, vector<8x128xf32>
      tpu.vector_store %arg8[%c0_27, %c0_28], %26 {strides = array<i32>} : memref<8x128xf32, #tpu.memory_space<vmem>>, vector<8x128xf32>,
    } else {
    }
    return
  }
  func.func @transform_0(%arg0: i32, %arg1: i32, %arg2: i32) -> (i32, i32) {
    %c0_i32 = arith.constant 0 : i32
    return %arg0, %arg2 : i32, i32
  }
  func.func @transform_1(%arg0: i32, %arg1: i32, %arg2: i32) -> (i32, i32) {
    %c0_i32 = arith.constant 0 : i32
    return %arg2, %arg1 : i32, i32
  }
  func.func @transform_2(%arg0: i32, %arg1: i32, %arg2: i32) -> (i32, i32) {
    %c0_i32 = arith.constant 0 : i32
    %c0_i32_0 = arith.constant 0 : i32
    return %c0_i32, %arg1 : i32, i32
  }
  func.func @transform_3(%arg0: i32, %arg1: i32, %arg2: i32) -> (i32, i32) {
    %c0_i32 = arith.constant 0 : i32
    %c0_i32_0 = arith.constant 0 : i32
    return %arg2, %c0_i32 : i32, i32
  }
  func.func @transform_4(%arg0: i32, %arg1: i32, %arg2: i32) -> (i32, i32) {
    %c0_i32 = arith.constant 0 : i32
    %c0_i32_0 = arith.constant 0 : i32
    return %c0_i32, %arg1 : i32, i32
  }
  func.func @transform_5(%arg0: i32, %arg1: i32, %arg2: i32) -> (i32, i32) {
    %c0_i32 = arith.constant 0 : i32
    return %arg0, %arg1 : i32, i32
  }
}

module attributes {stable_mosaic.version = 11 : i64} {
  func.func @similarity_kernel(%arg0: i32, %arg1: memref<8x128xf32, #tpu.memory_space<vmem>>, %arg2: memref<8x128xf32, #tpu.memory_space<vmem>>, %arg3: memref<1x1xf32, #tpu.memory_space<smem>>, %arg4: memref<8x8xf32, #tpu.memory_space<vmem>>) attributes {dimension_semantics = [#tpu.dimension_semantics<arbitrary>], iteration_bounds = array<i64: 1>, scalar_prefetch = 0 : i64, scratch_operands = 0 : i64, tpu.core_type = #tpu.core_type<tc>, window_params = [{pipeline_mode = #tpu.pipeline_mode<synchronous>, transform_indices = @transform_0, window_bounds = array<i64: 8, 128>}, {pipeline_mode = #tpu.pipeline_mode<synchronous>, transform_indices = @transform_1, window_bounds = array<i64: 8, 128>}, {transform_indices = @transform_2, window_bounds = array<i64: 1, 1>}, {pipeline_mode = #tpu.pipeline_mode<synchronous>, transform_indices = @transform_3, window_bounds = array<i64: 8, 8>}]} {
    %c0 = arith.constant 0 : index
    %c0_0 = arith.constant 0 : index
    %0 = vector.load %arg1[%c0, %c0_0] : memref<8x128xf32, #tpu.memory_space<vmem>>, vector<8x128xf32>
    %c0_1 = arith.constant 0 : index
    %c0_2 = arith.constant 0 : index
    %1 = vector.load %arg2[%c0_1, %c0_2] : memref<8x128xf32, #tpu.memory_space<vmem>>, vector<8x128xf32>
    %2 = arith.mulf %0, %0 : vector<8x128xf32>
    %cst = arith.constant dense<0.000000e+00> : vector<8xf32>
    %3 = vector.multi_reduction <add>, %2, %cst [1] : vector<8x128xf32> to vector<8xf32>
    %4 = vector.shape_cast %3 : vector<8xf32> to vector<8x1xf32>
    %5 = math.sqrt %4 : vector<8x1xf32>
    %cst_3 = arith.constant 9.99999996E-13 : f32
    %6 = vector.broadcast %cst_3 : f32 to vector<8x1xf32>
    %7 = arith.maximumf %5, %6 : vector<8x1xf32>
    %8 = arith.mulf %1, %1 : vector<8x128xf32>
    %cst_4 = arith.constant dense<0.000000e+00> : vector<8xf32>
    %9 = vector.multi_reduction <add>, %8, %cst_4 [1] : vector<8x128xf32> to vector<8xf32>
    %10 = vector.shape_cast %9 : vector<8xf32> to vector<8x1xf32>
    %11 = math.sqrt %10 : vector<8x1xf32>
    %cst_5 = arith.constant 9.99999996E-13 : f32
    %12 = vector.broadcast %cst_5 : f32 to vector<8x1xf32>
    %13 = arith.maximumf %11, %12 : vector<8x1xf32>
    %14 = vector.broadcast %7 : vector<8x1xf32> to vector<8x128xf32>
    %15 = arith.divf %0, %14 : vector<8x128xf32>
    %16 = vector.broadcast %13 : vector<8x1xf32> to vector<8x128xf32>
    %17 = arith.divf %1, %16 : vector<8x128xf32>
    %cst_6 = arith.constant dense<0.000000e+00> : vector<8x8xf32>
    %18 = tpu.matmul %15, %17, %cst_6 {dimension_numbers = #tpu.dot_dimension_numbers<[1], [1], [0], [0], [0, 0, 1, 0], [], []>} : vector<8x128xf32>, vector<8x128xf32>, vector<8x8xf32> -> vector<8x8xf32>
    %c0_7 = arith.constant 0 : index
    %c0_8 = arith.constant 0 : index
    %19 = memref.load %arg3[%c0_7, %c0_8] : memref<1x1xf32, #tpu.memory_space<smem>>
    %20 = math.exp %19 : f32
    %21 = vector.broadcast %20 : f32 to vector<8x8xf32>
    %22 = arith.mulf %18, %21 : vector<8x8xf32>
    %c0_9 = arith.constant 0 : index
    %c0_10 = arith.constant 0 : index
    %23 = vector.load %arg4[%c0_9, %c0_10] : memref<8x8xf32, #tpu.memory_space<vmem>>, vector<8x8xf32>
    tpu.vector_store %arg4[%c0_9, %c0_10], %22 {strides = array<i32>} : memref<8x8xf32, #tpu.memory_space<vmem>>, vector<8x8xf32>,
    return
  }
  func.func @transform_0(%arg0: i32) -> (i32, i32) {
    %c0_i32 = arith.constant 0 : i32
    %c0_i32_0 = arith.constant 0 : i32
    %c0_i32_1 = arith.constant 0 : i32
    return %c0_i32, %c0_i32_0 : i32, i32
  }
  func.func @transform_1(%arg0: i32) -> (i32, i32) {
    %c0_i32 = arith.constant 0 : i32
    %c0_i32_0 = arith.constant 0 : i32
    %c0_i32_1 = arith.constant 0 : i32
    return %c0_i32, %c0_i32_0 : i32, i32
  }
  func.func @transform_2(%arg0: i32) -> (i32, i32) {
    %c0_i32 = arith.constant 0 : i32
    %c0_i32_0 = arith.constant 0 : i32
    %c0_i32_1 = arith.constant 0 : i32
    return %c0_i32, %c0_i32_0 : i32, i32
  }
  func.func @transform_3(%arg0: i32) -> (i32, i32) {
    %c0_i32 = arith.constant 0 : i32
    %c0_i32_0 = arith.constant 0 : i32
    %c0_i32_1 = arith.constant 0 : i32
    return %c0_i32, %c0_i32_0 : i32, i32
  }
}

</mosaic_0001>

<bundles_post_ra>
// kernel: qlora_vlm_forward.6
= control target key start
LH: loop header
LB: loop body
LE: loop exit
PB: predicated region body
PF: predicated region fallthrough
CT: control target
= control target key end

     0   :  { %vm25_vm0 = vcmask 31744   ;;  %v317_v2 = vmov 0.0   ;;  %vm197_vm1 = vcmask 1043456   ;;  %s411_s3 = inlined_call_operand.vmem [shape: bf16[128,4], index: 3, kind: input, shape index: {}]   ;;  %s412_s1 = inlined_call_operand.vmem [shape: bf16[128,128], index: 1, kind: input, shape index: {}]   ;;  %s413_s0 = inlined_call_operand.vmem [shape: bf16[8,128], index: 0, kind: input, shape index: {}]   ;;  %s414_s2 = inlined_call_operand.vmem [shape: f32[1,128], index: 2, kind: input, shape index: {}]   ;;  %s415_s4 = inlined_call_operand.vmem [shape: f32[4,128], index: 4, kind: input, shape index: {}]   ;;  %s416_s5 = inlined_call_operand.vmem [shape: f32[8,128], index: 5, kind: output, shape index: {}]  }
   0x1   :  { %v314_v0 = vld [vmem:[%s411_s3 + $0x38] sm:$0xff]  ;;  %v313_v1 = vld [vmem:[%s411_s3 + $0x30] sm:$0xff]  ;;  %26 = vst.msk [vmem:[#allocation3] sm:$0xff] %vm25_vm0, %v317_v2  ;;  %v312_v5 = vld [vmem:[%s411_s3 + $0x28] sm:$0xff] }
   0x2   :  { %173 = vmatpush.bf16.msra.mxu1 %v314_v0  ;;  %v306_v3 = vld [vmem:[%s412_s1 + $0x38] sm:$0xff]  ;;  %v305_v4 = vld [vmem:[%s412_s1 + $0x30] sm:$0xff]  ;;  %v304_v6 = vld [vmem:[%s412_s1 + $0x28] sm:$0xff] }
   0x3   :  { %93 = vmatpush.bf16.msra.mxu0 %v306_v3  ;;  %v311_v7 = vld [vmem:[%s411_s3 + $0x20] sm:$0xff]  ;;  %v310_v9 = vld [vmem:[%s411_s3 + $0x18] sm:$0xff]  ;;  %v309_v11 = vld [vmem:[%s411_s3 + $0x10] sm:$0xff] }
   0x4   :  { %v303_v8 = vld [vmem:[%s412_s1 + $0x20] sm:$0xff]  ;;  %v302_v10 = vld [vmem:[%s412_s1 + $0x18] sm:$0xff]  ;;  %v301_v12 = vld [vmem:[%s412_s1 + $0x10] sm:$0xff] }
   0x5   :  { %v308_v13 = vld [vmem:[%s411_s3 + $0x8] sm:$0xff]  ;;  %v307_v15 = vld [vmem:[%s411_s3] sm:$0xff] }
   0x6   :  { %174 = vmatpush.bf16.msra.mxu1 %v313_v1  ;;  %v300_v14 = vld [vmem:[%s412_s1 + $0x8] sm:$0xff]  ;;  %v27_v16 = vld [vmem:[%s413_s0] sm:$0xf] }
   0x7   :  { %94 = vmatpush.bf16.msra.mxu0 %v305_v4  ;;  %v299_v17 = vld [vmem:[%s412_s1] sm:$0xff] }
   0x8   :  { %v193_v18 = vld [vmem:[%s415_s4] sm:$0xf] }
   0x9   :  { %297 = vmatpush.msk.msra.mxu2 %vm197_vm1, %v193_v18  ;;  %v108_v19 = vld [vmem:[#allocation3] sm:$0xff] }
   0xa   :  { %175 = vmatpush.bf16.msra.mxu1 %v312_v5  ;;  %v316_v26 = vld [vmem:[%s414_s2] ss:$0 sm:$0xff] }
   0xb   :  { %95 = vmatpush.bf16.msra.mxu0 %v304_v6 }
   0xe   :  { %176 = vmatpush.bf16.msra.mxu1 %v311_v7 }
   0xf   :  { %96 = vmatpush.bf16.msra.mxu0 %v303_v8 }
  0x12   :  { %177 = vmatpush.bf16.msra.mxu1 %v310_v9 }
  0x13   :  { %97 = vmatpush.bf16.msra.mxu0 %v302_v10 }
  0x16   :  { %178 = vmatpush.bf16.msra.mxu1 %v309_v11 }
  0x17   :  { %98 = vmatpush.bf16.msra.mxu0 %v301_v12 }
  0x1a   :  { %179 = vmatpush.bf16.msra.mxu1 %v308_v13 }
  0x1b   :  { %99 = vmatpush.bf16.msra.mxu0 %v300_v14 }
  0x1e   :  { %180 = vmatpush.bf16.msra.mxu1 %v307_v15 }
  0x1f   :  { %100 = vmatpush.bf16.msra.mxu0 %v299_v17 }
  0x21   :  { %181 = vmatmul.bf16.vlgmr.msra.gmra.mxu1 %v27_v16 }
  0x22   :  { %101 = vmatmul.bf16.vlgmr.msra.gmra.mxu0 %v27_v16 }
  0x9e   :  { %v182_v20 = vpop.f32.mrf.mxu1 }
  0x9f   :  { %v186_v21 = vadd.f32 %v182_v20, %v108_v19  ;;  %v102_v24 = vpop.f32.mrf.mxu0 }
  0xa0   :  { %v226_v27 = vadd.f32 %v316_v26, %v102_v24 }
  0xa1   :  { %188 = vst.msk [vmem:[#allocation3] sm:$0xff] %vm25_vm0, %v186_v21 }
  0xa6   :  { %v184_v22 = vpop.f32.mrf.mxu1 }
  0xa7   :  { %v104_v25 = vpop.f32.mrf.mxu0 }
  0xa8   :  { %v192_v23 = vld [vmem:[#allocation3] sm:$0xff] }
  0xa9   :  { %298 = vmatmul.msk.f32.vlgmr.msra.gmra.mxu2 %vm25_vm0, %v192_v23 }
 0x12c   :  { %v218_v28 = vpop.f32.mrf.mxu2 }
 0x12d   :  { %v227_v29 = vadd.f32 %v226_v27, %v218_v28 }
 0x12f   :  { %228 = vst [vmem:[%s416_s5] sm:$0xff] %v227_v29 }

// kernel: qlora_vlm_forward.5
= control target key start
LH: loop header
LB: loop body
LE: loop exit
PB: predicated region body
PF: predicated region fallthrough
CT: control target
= control target key end

     0   :  { %s1116_s18 = smov 0   ;;  %s1118_s19 = smov 0   ;;  %s1206_s0 = inlined_call_operand.vmem [shape: bf16[8,768], index: 0, kind: input, shape index: {}]   ;;  %s1207_s1 = inlined_call_operand.vmem [shape: bf16[768,128], index: 1, kind: input, shape index: {}]   ;;  %s1208_s2 = inlined_call_operand.vmem [shape: f32[1,128], index: 2, kind: input, shape index: {}]   ;;  %s1209_s3 = inlined_call_operand.vmem [shape: bf16[768,4], index: 3, kind: input, shape index: {}]   ;;  %s1210_s4 = inlined_call_operand.vmem [shape: f32[4,128], index: 4, kind: input, shape index: {}]   ;;  %s1211_s5 = inlined_call_operand.vmem [shape: f32[8,128], index: 5, kind: output, shape index: {}]  }
   0x1   :  { %s1120_s20 = smov 0  }
   0x2 LB: > { %s27_s21 = sadd.s32 1, %s1079_s19  ;;  %p861_p0 = scmp.ge.s32.totalorder %s1083_s20, 1  ;;  %s1083_s20 = sphi %s1120_s20, %s15_s20   ;;  %s1079_s19 = sphi %s1118_s19, %s1213_s19   ;;  %s1075_s18 = sphi %s1116_s18, %s1212_s18  }
   0x3   : > { %p28_p1 = scmp.ge.s32.totalorder %s27_s21, 3  ;;  %p259_p2 = scmp.lt.s32.totalorder %s1083_s20, 4 }
   0x5   : > { %s1215_s21 = smov (%p28_p1, %s27_s21), 0  ;;  %p260_p3 = pnand %p861_p0, %p259_p2 }
   0x6   : > { %s862_s22 = sshll.u32 (!%p260_p3), %s1075_s18, 1  ;;  %s864_s23 = sshll.u32 (!%p260_p3), %s1075_s18, 5 }
   0x7   : > { %263 = sbr.rel (%p260_p3) target bundleno = 333 (0x14d), region = 40  ;;  %p316_p4 = scmp.lt.s32.totalorder (!%p260_p3), %s862_s22, 5 }
   0x8   : > { %p324_p5 = scmp.lt.s32.totalorder (!%p260_p3), %s864_s23, 95  ;;  %p868_p6 = scmp.ne.s32.totalorder (!%p260_p3), %s1075_s18, 0 }
   0xc   : > { %s1217_s22 = smov (!%p316_p4, %s862_s22), 5  ;;  %s1219_s23 = smov (!%p324_p5, %s864_s23), 95 }
   0xd   : > { %s863_s24 = sshll.u32 %s1217_s22, 2  ;;  %s865_s28 = sshll.u32 %s1219_s23, 2 }
   0xe   : > { %s1141_s27 = scalar_lea.vmem %s1206_s0, %s863_s24  ;;  %s1146_s6 = scalar_lea.vmem %s1207_s1, %s865_s28 }
   0xf   : > { %s1151_s9 = scalar_lea.vmem %s1209_s3, %s865_s28  ;;  %355 = sbr.rel (%p868_p6) target bundleno = 23 (0x17), region = 44 }
  0x14   : > { %vm357_vm0 = vcmask 31744   ;;  %v1085_v0 = vmov 0.0  }
  0x15   : > { %356 = vst [vmem:[#allocation2] sm:$0xff] %v1085_v0 }
  0x16   : > { %358 = vst.msk [vmem:[#allocation3] sm:$0xff] %vm357_vm0, %v1085_v0 }
  0x17 PF: > { %v1010_v1 = vld [vmem:[%s1146_s6 + $0x38] sm:$0xff]  ;;  %v1009_v5 = vld [vmem:[%s1146_s6 + $0x30] sm:$0xff]  ;;  %v1008_v9 = vld [vmem:[%s1146_s6 + $0x28] sm:$0xff]  ;;  %vm680_vm1 = vcmask 31744   ;;  %p997_p7 = scmp.ne.s32.totalorder %s1075_s18, 2 }
  0x18   : > { %v1018_v2 = vld [vmem:[%s1146_s6 + $0x78] sm:$0xff]  ;;  %496 = vmatpush.bf16.msra.mxu0 %v1010_v1  ;;  %v1017_v6 = vld [vmem:[%s1146_s6 + $0x70] sm:$0xff]  ;;  %v1016_v10 = vld [vmem:[%s1146_s6 + $0x68] sm:$0xff] }
  0x19   : > { %v1026_v3 = vld [vmem:[%s1151_s9 + $0x38] sm:$0xff]  ;;  %509 = vmatpush.bf16.msra.mxu1 %v1018_v2  ;;  %v1025_v7 = vld [vmem:[%s1151_s9 + $0x30] sm:$0xff]  ;;  %v1024_v11 = vld [vmem:[%s1151_s9 + $0x28] sm:$0xff] }
  0x1a   : > { %v1034_v4 = vld [vmem:[%s1151_s9 + $0x78] sm:$0xff]  ;;  %653 = vmatpush.bf16.msra.mxu2 %v1026_v3  ;;  %v1033_v8 = vld [vmem:[%s1151_s9 + $0x70] sm:$0xff]  ;;  %v1032_v12 = vld [vmem:[%s1151_s9 + $0x68] sm:$0xff] }
  0x1b   : > { %666 = vmatpush.bf16.msra.mxu3 %v1034_v4  ;;  %v1007_v13 = vld [vmem:[%s1146_s6 + $0x20] sm:$0xff]  ;;  %v1006_v17 = vld [vmem:[%s1146_s6 + $0x18] sm:$0xff]  ;;  %v1005_v21 = vld [vmem:[%s1146_s6 + $0x10] sm:$0xff] }
  0x1c   : > { %497 = vmatpush.bf16.msra.mxu0 %v1009_v5  ;;  %v1015_v14 = vld [vmem:[%s1146_s6 + $0x60] sm:$0xff]  ;;  %v1014_v18 = vld [vmem:[%s1146_s6 + $0x58] sm:$0xff]  ;;  %v1013_v22 = vld [vmem:[%s1146_s6 + $0x50] sm:$0xff] }
  0x1d   : > { %510 = vmatpush.bf16.msra.mxu1 %v1017_v6  ;;  %v1023_v15 = vld [vmem:[%s1151_s9 + $0x20] sm:$0xff]  ;;  %v1022_v19 = vld [vmem:[%s1151_s9 + $0x18] sm:$0xff]  ;;  %v1021_v23 = vld [vmem:[%s1151_s9 + $0x10] sm:$0xff] }
  0x1e   : > { %654 = vmatpush.bf16.msra.mxu2 %v1025_v7  ;;  %v1031_v16 = vld [vmem:[%s1151_s9 + $0x60] sm:$0xff]  ;;  %v1030_v20 = vld [vmem:[%s1151_s9 + $0x58] sm:$0xff]  ;;  %v1029_v24 = vld [vmem:[%s1151_s9 + $0x50] sm:$0xff] }
  0x1f   : > { %667 = vmatpush.bf16.msra.mxu3 %v1033_v8  ;;  %v1004_v25 = vld [vmem:[%s1146_s6 + $0x8] sm:$0xff]  ;;  %v359_v27 = vld [vmem:[%s1141_s27] sm:$0xff] }
  0x20   : > { %498 = vmatpush.bf16.msra.mxu0 %v1008_v9  ;;  %v1012_v26 = vld [vmem:[%s1146_s6 + $0x48] sm:$0xff]  ;;  %v394_v30 = vunpack.c.l.b16 %v359_v27  ;;  %v395_v31 = vunpack.c.h.b16 %v359_v27  ;;  %v1003_v32 = vld [vmem:[%s1146_s6] sm:$0xff] }
  0x21   : > { %511 = vmatpush.bf16.msra.mxu1 %v1016_v10  ;;  %v1020_v28 = vld [vmem:[%s1151_s9 + $0x8] sm:$0xff]  ;;  %v1011_v33 = vld [vmem:[%s1146_s6 + $0x40] sm:$0xff] }
  0x22   : > { %655 = vmatpush.bf16.msra.mxu2 %v1024_v11  ;;  %v1028_v29 = vld [vmem:[%s1151_s9 + $0x48] sm:$0xff]  ;;  %v1019_v34 = vld [vmem:[%s1151_s9] sm:$0xff]  ;;  %v396_v36 = vpack.c.b16 %v394_v30, %v394_v30  ;;  %v397_v37 = vpack.c.b16 %v395_v31, %v395_v31 }
  0x23   : > { %668 = vmatpush.bf16.msra.mxu3 %v1032_v12  ;;  %v1027_v35 = vld [vmem:[%s1151_s9 + $0x40] sm:$0xff]  ;;  %v524_v44 = vld [vmem:[#allocation3] sm:$0xff] }
  0x24   : > { %499 = vmatpush.bf16.msra.mxu0 %v1007_v13  ;;  %v360_v39 = vld [vmem:[#allocation2] sm:$0xff] }
  0x25   : > { %512 = vmatpush.bf16.msra.mxu1 %v1015_v14 }
  0x26   : > { %656 = vmatpush.bf16.msra.mxu2 %v1023_v15 }
  0x27   : > { %669 = vmatpush.bf16.msra.mxu3 %v1031_v16 }
  0x28   : > { %500 = vmatpush.bf16.msra.mxu0 %v1006_v17 }
  0x29   : > { %513 = vmatpush.bf16.msra.mxu1 %v1014_v18 }
  0x2a   : > { %657 = vmatpush.bf16.msra.mxu2 %v1022_v19 }
  0x2b   : > { %670 = vmatpush.bf16.msra.mxu3 %v1030_v20 }
  0x2c   : > { %501 = vmatpush.bf16.msra.mxu0 %v1005_v21 }
  0x2d   : > { %514 = vmatpush.bf16.msra.mxu1 %v1013_v22 }
  0x2e   : > { %658 = vmatpush.bf16.msra.mxu2 %v1021_v23 }
  0x2f   : > { %671 = vmatpush.bf16.msra.mxu3 %v1029_v24 }
  0x30   : > { %502 = vmatpush.bf16.msra.mxu0 %v1004_v25 }
  0x31   : > { %515 = vmatpush.bf16.msra.mxu1 %v1012_v26 }
  0x32   : > { %659 = vmatpush.bf16.msra.mxu2 %v1020_v28 }
  0x33   : > { %672 = vmatpush.bf16.msra.mxu3 %v1028_v29 }
  0x34   : > { %503 = vmatpush.bf16.msra.mxu0 %v1003_v32 }
  0x35   : > { %516 = vmatpush.bf16.msra.mxu1 %v1011_v33 }
  0x36   : > { %660 = vmatpush.bf16.msra.mxu2 %v1019_v34 }
  0x37   : > { %673 = vmatpush.bf16.msra.mxu3 %v1027_v35  ;;  %504 = vmatmul.bf16.vlgmr.msra.gmra.mxu0 %v396_v36 }
  0x38   : > { %517 = vmatmul.bf16.vlgmr.msra.gmra.mxu1 %v397_v37 }
  0x39   : > { %661 = vmatmul.bf16.vlgmr.msra.gmra.mxu2 %v396_v36 }
  0x3a   : > { %674 = vmatmul.bf16.vlgmr.msra.gmra.mxu3 %v397_v37 }
  0xb4   : > { %v505_v38 = vpop.f32.mrf.mxu0 }
  0xb5   : > { %v518_v40 = vpop.f32.mrf.mxu1 }
  0xb6   : > { %v519_v41 = vadd.f32 %v518_v40, %v505_v38 }
  0xb8   : > { %v522_v42 = vadd.f32 %v519_v41, %v360_v39 }
  0xba   : > { %523 = vst [vmem:[#allocation2] sm:$0xff] %v522_v42 }
  0xbc   : > { %v662_v43 = vpop.f32.mrf.mxu2  ;;  %v507_v47 = vpop.f32.mrf.mxu0 }
  0xbd   : > { %v675_v45 = vpop.f32.mrf.mxu3  ;;  %v520_v48 = vpop.f32.mrf.mxu1 }
  0xbe   : > { %v676_v46 = vadd.f32 %v675_v45, %v662_v43 }
  0xc0   : > { %v679_v49 = vadd.f32 %v676_v46, %v524_v44 }
  0xc1   : > { %685 = sbr.rel (%p997_p7) target bundleno = 333 (0x14d), region = 48 }
  0xc2   : > { %681 = vst.msk [vmem:[#allocation3] sm:$0xff] %vm680_vm1, %v679_v49 }
  0xc4   : > { %v664_v50 = vpop.f32.mrf.mxu2 }
  0xc5   : > { %v677_v51 = vpop.f32.mrf.mxu3 }
  0xc6   : > { %v687_v52 = vld [vmem:[%s1210_s4] sm:$0xf]  ;;  %vm691_vm2 = vcmask 1043456  }
  0xc7   : > { %998 = vmatpush.msk.msra.mxu0 %vm691_vm2, %v687_v52  ;;  %v1060_v54 = vld [vmem:[%s1208_s2] ss:$0 sm:$0xff] }
  0xc8   : > { %v715_v55 = vld [vmem:[#allocation2] sm:$0xff] }
  0xc9   : > { %v686_v53 = vld [vmem:[#allocation3] sm:$0xff]  ;;  %v720_v56 = vadd.f32 %v1060_v54, %v715_v55 }
  0xca   : > { %999 = vmatmul.msk.f32.vlgmr.msra.gmra.mxu0 %vm680_vm1, %v686_v53 }
 0x147   : > { %v712_v57 = vpop.f32.mrf.mxu0 }
 0x148   : > { %v721_v58 = vadd.f32 %v720_v56, %v712_v57 }
 0x14a   : > { %v722_v59 = vmax.f32 %v721_v58, 0.0 }
 0x14c   : > { %723 = vst [vmem:[%s1211_s5] sm:$0xff] %v722_v59 }
 0x14d PF: > { %s15_s20 = sadd.s32 1, %s1083_s20   ;;  %s1212_s18 = smov %s1079_s19 }
 0x14e   : > { %p12_p8 = scmp.ge.s32.totalorder %s15_s20, 5   ;;  %s1213_s19 = smov %s1215_s21 }
 0x150   :  { %14 = sbr.rel (!%p12_p8) target bundleno = 2 (0x2), region = 90 }

// kernel: qlora_vlm_forward.9
= control target key start
LH: loop header
LB: loop body
LE: loop exit
PB: predicated region body
PF: predicated region fallthrough
CT: control target
= control target key end

     0   :  { %vm106_vm12 = vcmask 64512   ;;  %s161_s1 = inlined_call_operand.vmem [shape: f32[8,128], index: 1, kind: input, shape index: {}]   ;;  %s162_s0 = inlined_call_operand.vmem [shape: f32[8,128], index: 0, kind: input, shape index: {}]   ;;  %s163_s2 = inlined_call_operand.<no memory space> [shape: f32[1,1], index: 2, kind: input, shape index: {}]   ;;  %s164_s3 = inlined_call_operand.vmem [shape: f32[8,8], index: 3, kind: output, shape index: {}]  }
   0x1   :  { %v16_v0 = vld [vmem:[%s161_s1] sm:$0xff]  ;;  %v100_v17 = vstv %s163_s2 }
   0x2   :  { %v33_v1 = vmul.f32 %v16_v0, %v16_v0  ;;  %v150_v2 = vld [vmem:[%s162_s0] sm:$0xff]  ;;  %v101_v20 = vmul.f32 1.442695, %v100_v17 }
   0x3   :  { %v17_v3 = vmul.f32 %v150_v2, %v150_v2 }
   0x4   :  { %34 = vadd.xlane.f32.xlu0 %v33_v1 }
   0xc   :  { %18 = vadd.xlane.f32.xlu0 %v17_v3 }
  0x77   :  { %v35_v4 = vpop.xlane.xlu0 %34 }
  0x78   :  { %114 = vrsqrt.f32 %v35_v4  ;;  %vm43_vm0 = vcmp.eq.f32.partialorder %v35_v4, inf  ;;  %v46_v16 = vand.u32 2147483648, %v35_v4  ;;  %vm45_vm1 = vcmp.eq.f32.partialorder %v35_v4, 0.0 }
  0x7e   :  { %v115_v5 = vpop.eup %114 }
  0x7f   :  { %v37_v6 = vmul.f32 %v115_v5, %v35_v4  ;;  %v19_v7 = vpop.xlane.xlu0 %18 }
  0x80   :  { %116 = vrsqrt.f32 %v19_v7  ;;  %vm27_vm2 = vcmp.eq.f32.partialorder %v19_v7, inf  ;;  %v30_v26 = vand.u32 2147483648, %v19_v7  ;;  %vm29_vm3 = vcmp.eq.f32.partialorder %v19_v7, 0.0 }
  0x81   :  { %v38_v8 = vmul.f32 %v115_v5, %v37_v6  ;;  %118 = vpow2.f32 %v101_v20 }
  0x83   :  { %v39_v9 = vmul.f32 0.5, %v38_v8 }
  0x85   :  { %v40_v10 = vsub.f32 1.5, %v39_v9 }
  0x86   :  { %v117_v11 = vpop.eup %116 }
  0x87   :  { %v41_v12 = vmul.f32 %v115_v5, %v40_v10  ;;  %v21_v13 = vmul.f32 %v117_v11, %v19_v7  ;;  %v119_v27 = vpop.eup %118 }
  0x88   :  { %112 = vpush %v119_v27 }
  0x89   :  { %v42_v14 = vmul.f32 %v41_v12, %v35_v4  ;;  %v22_v15 = vmul.f32 %v117_v11, %v21_v13 }
  0x8b   :  { %v44_v18 = vsel %vm43_vm0, %v35_v4, %v42_v14  ;;  %v23_v19 = vmul.f32 0.5, %v22_v15 }
  0x8c   :  { %v47_v21 = vsel %vm45_vm1, %v46_v16, %v44_v18 }
  0x8d   :  { %v24_v22 = vsub.f32 1.5, %v23_v19  ;;  %v48_v23 = vmax.f32 %v47_v21, 1e-12 }
  0x8f   :  { %v25_v24 = vmul.f32 %v117_v11, %v24_v22  ;;  %120 = vrcp.f32 %v48_v23  ;;  %v75_v34 = vand.u32 2147483648, %v48_v23  ;;  %v73_v36 = vand.u32 2147483647, %v48_v23 }
  0x90   :  { %vm69_vm5 = vweird.f32 %v48_v23 }
  0x91   :  { %v26_v25 = vmul.f32 %v25_v24, %v19_v7  ;;  %v76_v39 = vor.u32 1.1754944e-38, %v75_v34  ;;  %vm74_vm7 = vcmp.eq.f32.partialorder %v73_v36, 8.507059e+37 }
  0x93   :  { %v28_v28 = vsel %vm27_vm2, %v19_v7, %v26_v25 }
  0x94   :  { %v31_v29 = vsel %vm29_vm3, %v30_v26, %v28_v28 }
  0x95   :  { %v121_v30 = vpop.eup %120  ;;  %v32_v31 = vmax.f32 %v31_v29, 1e-12 }
  0x96   :  { %v65_v32 = vmul.f32 %v121_v30, %v48_v23  ;;  %vm70_vm4 = vweird.f32 %v121_v30 }
  0x97   :  { %122 = vrcp.f32 %v32_v31  ;;  %vm71_vm6 = vmor %vm69_vm5, %vm70_vm4  ;;  %v60_v45 = vand.u32 2147483648, %v32_v31  ;;  %v58_v47 = vand.u32 2147483647, %v32_v31  ;;  %vm54_vm9 = vweird.f32 %v32_v31 }
  0x98   :  { %v66_v33 = vsub.f32 1.0, %v65_v32 }
  0x99   :  { %v61_v49 = vor.u32 1.1754944e-38, %v60_v45  ;;  %vm59_vm11 = vcmp.eq.f32.partialorder %v58_v47, 8.507059e+37 }
  0x9a   :  { %v67_v35 = vmul.f32 %v121_v30, %v66_v33 }
  0x9c   :  { %v68_v37 = vadd.f32 %v121_v30, %v67_v35 }
  0x9d   :  { %v123_v38 = vpop.eup %122 }
  0x9e   :  { %v72_v40 = vsel %vm71_vm6, %v121_v30, %v68_v37  ;;  %v50_v41 = vmul.f32 %v123_v38, %v32_v31  ;;  %vm55_vm8 = vweird.f32 %v123_v38 }
  0x9f   :  { %v77_v42 = vsel %vm74_vm7, %v76_v39, %v72_v40  ;;  %vm56_vm10 = vmor %vm54_vm9, %vm55_vm8 }
  0xa0   :  { %v78_v43 = vmul.f32 %v77_v42, %v16_v0  ;;  %v51_v44 = vsub.f32 1.0, %v50_v41 }
  0xa2   :  { %94 = vmatpush.xpose.msra.mxu0 %v78_v43  ;;  %v52_v46 = vmul.f32 %v123_v38, %v51_v44 }
  0xa4   :  { %v53_v48 = vadd.f32 %v123_v38, %v52_v46 }
  0xa6   :  { %v57_v50 = vsel %vm56_vm10, %v123_v38, %v53_v48 }
  0xa7   :  { %v62_v51 = vsel %vm59_vm11, %v61_v49, %v57_v50 }
  0xa8   :  { %v63_v52 = vmul.f32 %v62_v51, %v150_v2 }
  0xaa   :  { %95 = vmatmul.f32.vlgmr.msra.gmra.mxu0 %v63_v52 }
  0xb9   :  { %s113_s2 = spop %112 }
  0xba   :  { %v104_v53 = vstv %s113_s2 }
 0x127   :  { %v96_v54 = vpop.f32.mrf.mxu0 }
 0x128   :  { %v105_v55 = vmul.f32 %v104_v53, %v96_v54 }
 0x12a   :  { %107 = vst.msk [vmem:[%s164_s3] sm:$0xff] %vm106_vm12, %v105_v55 }

// kernel: qlora_vlm_forward.7
= control target key start
LH: loop header
LB: loop body
LE: loop exit
PB: predicated region body
PF: predicated region fallthrough
CT: control target
= control target key end

     0   :  { %vm25_vm0 = vcmask 31744   ;;  %v318_v2 = vmov 0.0   ;;  %vm197_vm1 = vcmask 1043456   ;;  %s412_s3 = inlined_call_operand.vmem [shape: bf16[128,4], index: 3, kind: input, shape index: {}]   ;;  %s413_s1 = inlined_call_operand.vmem [shape: bf16[128,128], index: 1, kind: input, shape index: {}]   ;;  %s414_s0 = inlined_call_operand.vmem [shape: bf16[8,128], index: 0, kind: input, shape index: {}]   ;;  %s415_s2 = inlined_call_operand.vmem [shape: f32[1,128], index: 2, kind: input, shape index: {}]   ;;  %s416_s4 = inlined_call_operand.vmem [shape: f32[4,128], index: 4, kind: input, shape index: {}]   ;;  %s417_s5 = inlined_call_operand.vmem [shape: f32[8,128], index: 5, kind: output, shape index: {}]  }
   0x1   :  { %v315_v0 = vld [vmem:[%s412_s3 + $0x38] sm:$0xff]  ;;  %v314_v1 = vld [vmem:[%s412_s3 + $0x30] sm:$0xff]  ;;  %26 = vst.msk [vmem:[#allocation3] sm:$0xff] %vm25_vm0, %v318_v2  ;;  %v313_v5 = vld [vmem:[%s412_s3 + $0x28] sm:$0xff] }
   0x2   :  { %173 = vmatpush.bf16.msra.mxu1 %v315_v0  ;;  %v307_v3 = vld [vmem:[%s413_s1 + $0x38] sm:$0xff]  ;;  %v306_v4 = vld [vmem:[%s413_s1 + $0x30] sm:$0xff]  ;;  %v305_v6 = vld [vmem:[%s413_s1 + $0x28] sm:$0xff] }
   0x3   :  { %93 = vmatpush.bf16.msra.mxu0 %v307_v3  ;;  %v312_v7 = vld [vmem:[%s412_s3 + $0x20] sm:$0xff]  ;;  %v311_v9 = vld [vmem:[%s412_s3 + $0x18] sm:$0xff]  ;;  %v310_v11 = vld [vmem:[%s412_s3 + $0x10] sm:$0xff] }
   0x4   :  { %v304_v8 = vld [vmem:[%s413_s1 + $0x20] sm:$0xff]  ;;  %v303_v10 = vld [vmem:[%s413_s1 + $0x18] sm:$0xff]  ;;  %v302_v12 = vld [vmem:[%s413_s1 + $0x10] sm:$0xff] }
   0x5   :  { %v309_v13 = vld [vmem:[%s412_s3 + $0x8] sm:$0xff]  ;;  %v308_v15 = vld [vmem:[%s412_s3] sm:$0xff] }
   0x6   :  { %174 = vmatpush.bf16.msra.mxu1 %v314_v1  ;;  %v301_v14 = vld [vmem:[%s413_s1 + $0x8] sm:$0xff]  ;;  %v27_v16 = vld [vmem:[%s414_s0] sm:$0xf] }
   0x7   :  { %94 = vmatpush.bf16.msra.mxu0 %v306_v4  ;;  %v300_v17 = vld [vmem:[%s413_s1] sm:$0xff] }
   0x8   :  { %v193_v18 = vld [vmem:[%s416_s4] sm:$0xf] }
   0x9   :  { %298 = vmatpush.msk.msra.mxu2 %vm197_vm1, %v193_v18  ;;  %v108_v19 = vld [vmem:[#allocation3] sm:$0xff] }
   0xa   :  { %175 = vmatpush.bf16.msra.mxu1 %v313_v5  ;;  %v317_v26 = vld [vmem:[%s415_s2] ss:$0 sm:$0xff] }
   0xb   :  { %95 = vmatpush.bf16.msra.mxu0 %v305_v6 }
   0xe   :  { %176 = vmatpush.bf16.msra.mxu1 %v312_v7 }
   0xf   :  { %96 = vmatpush.bf16.msra.mxu0 %v304_v8 }
  0x12   :  { %177 = vmatpush.bf16.msra.mxu1 %v311_v9 }
  0x13   :  { %97 = vmatpush.bf16.msra.mxu0 %v303_v10 }
  0x16   :  { %178 = vmatpush.bf16.msra.mxu1 %v310_v11 }
  0x17   :  { %98 = vmatpush.bf16.msra.mxu0 %v302_v12 }
  0x1a   :  { %179 = vmatpush.bf16.msra.mxu1 %v309_v13 }
  0x1b   :  { %99 = vmatpush.bf16.msra.mxu0 %v301_v14 }
  0x1e   :  { %180 = vmatpush.bf16.msra.mxu1 %v308_v15 }
  0x1f   :  { %100 = vmatpush.bf16.msra.mxu0 %v300_v17 }
  0x21   :  { %181 = vmatmul.bf16.vlgmr.msra.gmra.mxu1 %v27_v16 }
  0x22   :  { %101 = vmatmul.bf16.vlgmr.msra.gmra.mxu0 %v27_v16 }
  0x9e   :  { %v182_v20 = vpop.f32.mrf.mxu1 }
  0x9f   :  { %v186_v21 = vadd.f32 %v182_v20, %v108_v19  ;;  %v102_v24 = vpop.f32.mrf.mxu0 }
  0xa0   :  { %v226_v27 = vadd.f32 %v317_v26, %v102_v24 }
  0xa1   :  { %188 = vst.msk [vmem:[#allocation3] sm:$0xff] %vm25_vm0, %v186_v21 }
  0xa6   :  { %v184_v22 = vpop.f32.mrf.mxu1 }
  0xa7   :  { %v104_v25 = vpop.f32.mrf.mxu0 }
  0xa8   :  { %v192_v23 = vld [vmem:[#allocation3] sm:$0xff] }
  0xa9   :  { %299 = vmatmul.msk.f32.vlgmr.msra.gmra.mxu2 %vm25_vm0, %v192_v23 }
 0x12c   :  { %v218_v28 = vpop.f32.mrf.mxu2 }
 0x12d   :  { %v227_v29 = vadd.f32 %v226_v27, %v218_v28 }
 0x12f   :  { %v228_v30 = vmax.f32 %v227_v29, 0.0 }
 0x131   :  { %229 = vst [vmem:[%s417_s5] sm:$0xff] %v228_v30 }

</bundles_post_ra>
